<compile_context>
chip_gen: v7x
topology: tpu7x:2x2x1
jax: 0.10.0
libtpu: 0.0.40
codegen_flags: <defaults>
</compile_context>

<pallas_src>
import numpy as np
import jax
import jax.numpy as jnp
from jax.experimental import pallas as pl
from jax.experimental.pallas import tpu as pltpu

K = 5          # conv kernel size
PAD = 2        # 'same' padding for k=5, stride=1
CHANNELS = (8, 16, 32, 16, 8)   # in -> 16 -> 32 -> 16 -> out


def _conv1d_relu_im2col(h, w2d, b, tap_masks):
    """One Conv1d(k=5, s=1, p=2) + ReLU over a whole batch block.

    h:         (Cin, N)       bf16 activations, N = TB*L (batch folded into lanes)
    w2d:       (Cout, K*Cin)  bf16 im2col weights, column index = k*Cin + ci
    b:         (Cout, 1)      f32 bias
    tap_masks: list of (1, N) bf16 per-tap validity masks (kill cross-batch leak)
    returns (Cout, N) f32
    """
    cin, n = h.shape
    zeros = jnp.zeros((cin, PAD), dtype=h.dtype)
    hp = jnp.concatenate([zeros, h, zeros], axis=1)            # (Cin, N + 2*PAD)
    cols = []
    for k in range(K):
        chunk = hp[:, k:k + n]                                 # h shifted by (k - PAD)
        if k != PAD:                                           # center tap needs no mask
            chunk = chunk * tap_masks[k]
        cols.append(chunk)
    xcol = jnp.concatenate(cols, axis=0)                       # (K*Cin, N)
    acc = jnp.dot(w2d, xcol, preferred_element_type=jnp.float32)   # (Cout, N) f32
    return jnp.maximum(acc + b, 0.0)                           # bias + ReLU in f32


def _kernel(x_ref, mask_ref,
            w1_ref, b1_ref, w2_ref, b2_ref, w3_ref, b3_ref, w4_ref, b4_ref,
            o_ref):
    masks = mask_ref[...]                                      # (K, N) bf16
    tap_masks = [masks[k:k + 1, :] for k in range(K)]          # hoisted, one slice each
    layers = ((w1_ref, b1_ref), (w2_ref, b2_ref),
              (w3_ref, b3_ref), (w4_ref, b4_ref))
    h = x_ref[...]                                             # (Cin, N) bf16
    for li, (w_ref, b_ref) in enumerate(layers):
        acc = _conv1d_relu_im2col(h, w_ref[...], b_ref[...], tap_masks)
        if li + 1 < len(layers):
            h = acc.astype(h.dtype)                            # bf16 for next layer's MXU
        else:
            o_ref[...] = acc.astype(o_ref.dtype)               # (Cout, N) lane-dense store


def _pick_batch_block(B, L, budget_bytes=20 << 20):
    """Largest TB whose working set fits a conservative VMEM budget, preferring
    a divisor of B (no padded ghost rows)."""
    cmax = max(CHANNELS)
    per_tb = L * (
        2 * CHANNELS[0] * 2       # input block, bf16, double-buffered
        + 2 * CHANNELS[-1] * 4    # output block, f32, double-buffered
        + cmax * 2                # current activation, bf16
        + 2 * K * cmax * 2        # im2col matrix + shifted temporaries, bf16
        + cmax * 4                # f32 accumulator
        + 2 * K * 2               # per-tap masks, bf16
    )
    per_tb = max(1, int(per_tb * 1.25))      # headroom
    cap = max(1, min(B, budget_bytes // per_tb))
    tb = int(cap)
    if B % tb:
        for t in range(tb, max(0, tb - 128), -1):
            if B % t == 0 and 2 * t >= tb:   # close-enough divisor -> no ghost rows
                tb = t
                break
    return tb


def simple_conv_forward(x_ncl, params, *, compute_dtype=jnp.bfloat16, batch_block=None):
    """x_ncl: (B, C_in, L) float32 -> (B, C_out, L) float32 (PyTorch Conv1d NCL)."""
    B, c_in, L = x_ncl.shape
    assert c_in == CHANNELS[0]
    c_out = CHANNELS[-1]

    # Host-side weight prep: (Cout, Cin, K) -> im2col (Cout, K*Cin), cast to bf16.
    flat = []
    for (w, b) in params:
        cout, cin, kk = w.shape
        w2d = jnp.transpose(w, (0, 2, 1)).reshape(cout, kk * cin).astype(compute_dtype)
        flat.append((w2d, jnp.asarray(b, jnp.float32).reshape(-1, 1)))   # robust bias shape
    (w1, b1), (w2, b2), (w3, b3), (w4, b4) = flat

    TB = int(batch_block) if batch_block is not None else _pick_batch_block(B, L)
    nb = pl.cdiv(B, TB)
    Bp = nb * TB
    N = TB * L

    xb = x_ncl.astype(compute_dtype)                  # bf16 input DMA (halves HBM traffic)
    if Bp != B:
        xb = jnp.pad(xb, ((0, Bp - B), (0, 0), (0, 0)))
    # Fold the batch block into the lane axis: (nb, Cin, TB*L).
    x3 = xb.reshape(nb, TB, c_in, L).transpose(0, 2, 1, 3).reshape(nb, c_in, N)

    # Per-tap validity masks: column c holds in-element position (c % L); tap
    # offset d = k - PAD reads position (c % L) + d, valid iff it lies in [0, L).
    pos = np.arange(N) % L
    mask_np = np.stack(
        [((pos + (k - PAD) >= 0) & (pos + (k - PAD) < L)) for k in range(K)]
    ).astype(np.float32)
    masks = jnp.asarray(mask_np, dtype=compute_dtype)                     # (K, N)

    def full_spec(shape):
        nd = len(shape)
        return pl.BlockSpec(shape, lambda i, _nd=nd: (0,) * _nd)

    out3 = pl.pallas_call(
        _kernel,
        out_shape=jax.ShapeDtypeStruct((nb, c_out, N), jnp.float32),
        grid_spec=pltpu.PrefetchScalarGridSpec(
            num_scalar_prefetch=0,
            grid=(nb,),
            in_specs=[
                pl.BlockSpec((None, c_in, N), lambda i: (i, 0, 0)),
                full_spec(masks.shape),
                full_spec(w1.shape), full_spec(b1.shape),
                full_spec(w2.shape), full_spec(b2.shape),
                full_spec(w3.shape), full_spec(b3.shape),
                full_spec(w4.shape), full_spec(b4.shape),
            ],
            out_specs=pl.BlockSpec((None, c_out, N), lambda i: (i, 0, 0)),
        ),
        compiler_params=pltpu.CompilerParams(
            dimension_semantics=("parallel",),
            vmem_limit_bytes=32 << 20),
    )(x3, masks, w1, b1, w2, b2, w3, b3, w4, b4)

    out = out3.reshape(nb, c_out, TB, L).transpose(0, 2, 1, 3).reshape(Bp, c_out, L)
    return out[:B]


def init_params(key):
    """Deterministic synthetic init of the 4 Conv1d layers.

    Weights stored PyTorch-style (Cout, Cin, K); biases as (Cout, 1).
    """
    params = []
    for i in range(4):
        cin, cout = CHANNELS[i], CHANNELS[i + 1]
        key, kw, kb = jax.random.split(key, 3)
        fan_in = cin * K
        scale = 1.0 / jnp.sqrt(jnp.float32(fan_in))
        w = jax.random.normal(kw, (cout, cin, K), dtype=jnp.float32) * scale
        b = jax.random.normal(kb, (cout, 1), dtype=jnp.float32) * scale
        params.append((w, b))
    return params


def _reference_forward(x_ncl, params):
    """Pure-JAX f32 reference (lax.conv_general_dilated)."""
    h = x_ncl
    for (w, b) in params:                       # w: (Cout, Cin, K) == OIH
        h = jax.lax.conv_general_dilated(
            h, w, window_strides=(1,), padding=[(PAD, PAD)],
            dimension_numbers=("NCH", "OIH", "NCH"))
        h = h + b[None, :, :]
        h = jnp.maximum(h, 0.0)
    return h


if __name__ == "__main__":
    key = jax.random.PRNGKey(0)
    key, kx = jax.random.split(key)

    B, C_IN, L = 2, 8, 16
    x = jax.random.normal(kx, (B, C_IN, L), dtype=jnp.float32)

    params = init_params(key)

    out = simple_conv_forward(x, params)
    out = jax.block_until_ready(out)

    ref = _reference_forward(x, params)
    assert out.shape == (B, CHANNELS[-1], L), out.shape
    # bf16 MXU operands with f32 accumulation/epilogue -> loose tolerance vs f32 ref.
    assert jnp.allclose(out, ref, atol=5e-2, rtol=5e-2), \
        f"max abs err {jnp.max(jnp.abs(out - ref))}"

    print("KERNEL_OK")
</pallas_src>

<mosaic_0001>
module attributes {stable_mosaic.version = 11 : i64} {
  func.func @_kernel(%arg0: i32, %arg1: memref<1x8x32xbf16, #tpu.memory_space<vmem>>, %arg2: memref<5x32xbf16, #tpu.memory_space<vmem>>, %arg3: memref<16x40xbf16, #tpu.memory_space<vmem>>, %arg4: memref<16x1xf32, #tpu.memory_space<vmem>>, %arg5: memref<32x80xbf16, #tpu.memory_space<vmem>>, %arg6: memref<32x1xf32, #tpu.memory_space<vmem>>, %arg7: memref<16x160xbf16, #tpu.memory_space<vmem>>, %arg8: memref<16x1xf32, #tpu.memory_space<vmem>>, %arg9: memref<8x80xbf16, #tpu.memory_space<vmem>>, %arg10: memref<8x1xf32, #tpu.memory_space<vmem>>, %arg11: memref<1x8x32xf32, #tpu.memory_space<vmem>>) attributes {dimension_semantics = [#tpu.dimension_semantics<parallel>], iteration_bounds = array<i64: 1>, scalar_prefetch = 0 : i64, scratch_operands = 0 : i64, tpu.core_type = #tpu.core_type<tc>, window_params = [{transform_indices = @transform_0, window_bounds = array<i64: 1, 8, 32>}, {pipeline_mode = #tpu.pipeline_mode<synchronous>, transform_indices = @transform_1, window_bounds = array<i64: 5, 32>}, {pipeline_mode = #tpu.pipeline_mode<synchronous>, transform_indices = @transform_2, window_bounds = array<i64: 16, 40>}, {pipeline_mode = #tpu.pipeline_mode<synchronous>, transform_indices = @transform_3, window_bounds = array<i64: 16, 1>}, {pipeline_mode = #tpu.pipeline_mode<synchronous>, transform_indices = @transform_4, window_bounds = array<i64: 32, 80>}, {pipeline_mode = #tpu.pipeline_mode<synchronous>, transform_indices = @transform_5, window_bounds = array<i64: 32, 1>}, {pipeline_mode = #tpu.pipeline_mode<synchronous>, transform_indices = @transform_6, window_bounds = array<i64: 16, 160>}, {pipeline_mode = #tpu.pipeline_mode<synchronous>, transform_indices = @transform_7, window_bounds = array<i64: 16, 1>}, {pipeline_mode = #tpu.pipeline_mode<synchronous>, transform_indices = @transform_8, window_bounds = array<i64: 8, 80>}, {pipeline_mode = #tpu.pipeline_mode<synchronous>, transform_indices = @transform_9, window_bounds = array<i64: 8, 1>}, {transform_indices = @transform_10, window_bounds = array<i64: 1, 8, 32>}]} {
    %c0 = arith.constant 0 : index
    %c0_0 = arith.constant 0 : index
    %0 = vector.load %arg2[%c0, %c0_0] : memref<5x32xbf16, #tpu.memory_space<vmem>>, vector<5x32xbf16>
    %1 = vector.extract_strided_slice %0 {offsets = [0, 0], sizes = [1, 32], strides = [1, 1]} : vector<5x32xbf16> to vector<1x32xbf16>
    %2 = vector.extract_strided_slice %0 {offsets = [1, 0], sizes = [1, 32], strides = [1, 1]} : vector<5x32xbf16> to vector<1x32xbf16>
    %3 = vector.extract_strided_slice %0 {offsets = [3, 0], sizes = [1, 32], strides = [1, 1]} : vector<5x32xbf16> to vector<1x32xbf16>
    %4 = vector.extract_strided_slice %0 {offsets = [4, 0], sizes = [1, 32], strides = [1, 1]} : vector<5x32xbf16> to vector<1x32xbf16>
    %c0_1 = arith.constant 0 : index
    %c0_2 = arith.constant 0 : index
    %c0_3 = arith.constant 0 : index
    %5 = vector.load %arg1[%c0_1, %c0_2, %c0_3] : memref<1x8x32xbf16, #tpu.memory_space<vmem>>, vector<1x8x32xbf16>
    %6 = vector.shape_cast %5 : vector<1x8x32xbf16> to vector<8x32xbf16>
    %c0_4 = arith.constant 0 : index
    %c0_5 = arith.constant 0 : index
    %7 = vector.load %arg3[%c0_4, %c0_5] : memref<16x40xbf16, #tpu.memory_space<vmem>>, vector<16x40xbf16>
    %c0_6 = arith.constant 0 : index
    %c0_7 = arith.constant 0 : index
    %8 = vector.load %arg4[%c0_6, %c0_7] : memref<16x1xf32, #tpu.memory_space<vmem>>, vector<16x1xf32>
    %cst = arith.constant 0.000000e+00 : bf16
    %9 = vector.broadcast %cst : bf16 to vector<8x2xbf16>
    %10 = tpu.concatenate %9, %6, %9 in 1 : vector<8x2xbf16>, vector<8x32xbf16>, vector<8x2xbf16> -> vector<8x36xbf16>
    %11 = vector.extract_strided_slice %10 {offsets = [0, 0], sizes = [8, 32], strides = [1, 1]} : vector<8x36xbf16> to vector<8x32xbf16>
    %12 = vector.broadcast %1 : vector<1x32xbf16> to vector<8x32xbf16>
    %13 = arith.mulf %11, %12 : vector<8x32xbf16>
    %14 = vector.extract_strided_slice %10 {offsets = [0, 1], sizes = [8, 32], strides = [1, 1]} : vector<8x36xbf16> to vector<8x32xbf16>
    %15 = vector.broadcast %2 : vector<1x32xbf16> to vector<8x32xbf16>
    %16 = arith.mulf %14, %15 : vector<8x32xbf16>
    %17 = vector.extract_strided_slice %10 {offsets = [0, 2], sizes = [8, 32], strides = [1, 1]} : vector<8x36xbf16> to vector<8x32xbf16>
    %18 = vector.extract_strided_slice %10 {offsets = [0, 3], sizes = [8, 32], strides = [1, 1]} : vector<8x36xbf16> to vector<8x32xbf16>
    %19 = vector.broadcast %3 : vector<1x32xbf16> to vector<8x32xbf16>
    %20 = arith.mulf %18, %19 : vector<8x32xbf16>
    %21 = vector.extract_strided_slice %10 {offsets = [0, 4], sizes = [8, 32], strides = [1, 1]} : vector<8x36xbf16> to vector<8x32xbf16>
    %22 = vector.broadcast %4 : vector<1x32xbf16> to vector<8x32xbf16>
    %23 = arith.mulf %21, %22 : vector<8x32xbf16>
    %24 = tpu.concatenate %13, %16, %17, %20, %23 in 0 : vector<8x32xbf16>, vector<8x32xbf16>, vector<8x32xbf16>, vector<8x32xbf16>, vector<8x32xbf16> -> vector<40x32xbf16>
    %cst_8 = arith.constant dense<0.000000e+00> : vector<16x32xf32>
    %25 = tpu.matmul %7, %24, %cst_8 {dimension_numbers = #tpu.dot_dimension_numbers<[1], [0], [0], [1], [0, 0, 1, 1], [], []>} : vector<16x40xbf16>, vector<40x32xbf16>, vector<16x32xf32> -> vector<16x32xf32>
    %26 = vector.broadcast %8 : vector<16x1xf32> to vector<16x32xf32>
    %27 = arith.addf %25, %26 : vector<16x32xf32>
    %cst_9 = arith.constant 0.000000e+00 : f32
    %28 = vector.broadcast %cst_9 : f32 to vector<16x32xf32>
    %29 = arith.maximumf %27, %28 : vector<16x32xf32>
    %30 = arith.truncf %29 : vector<16x32xf32> to vector<16x32xbf16>
    %c0_10 = arith.constant 0 : index
    %c0_11 = arith.constant 0 : index
    %31 = vector.load %arg5[%c0_10, %c0_11] : memref<32x80xbf16, #tpu.memory_space<vmem>>, vector<32x80xbf16>
    %c0_12 = arith.constant 0 : index
    %c0_13 = arith.constant 0 : index
    %32 = vector.load %arg6[%c0_12, %c0_13] : memref<32x1xf32, #tpu.memory_space<vmem>>, vector<32x1xf32>
    %cst_14 = arith.constant 0.000000e+00 : bf16
    %33 = vector.broadcast %cst_14 : bf16 to vector<16x2xbf16>
    %34 = tpu.concatenate %33, %30, %33 in 1 : vector<16x2xbf16>, vector<16x32xbf16>, vector<16x2xbf16> -> vector<16x36xbf16>
    %35 = vector.extract_strided_slice %34 {offsets = [0, 0], sizes = [16, 32], strides = [1, 1]} : vector<16x36xbf16> to vector<16x32xbf16>
    %36 = vector.broadcast %1 : vector<1x32xbf16> to vector<16x32xbf16>
    %37 = arith.mulf %35, %36 : vector<16x32xbf16>
    %38 = vector.extract_strided_slice %34 {offsets = [0, 1], sizes = [16, 32], strides = [1, 1]} : vector<16x36xbf16> to vector<16x32xbf16>
    %39 = vector.broadcast %2 : vector<1x32xbf16> to vector<16x32xbf16>
    %40 = arith.mulf %38, %39 : vector<16x32xbf16>
    %41 = vector.extract_strided_slice %34 {offsets = [0, 2], sizes = [16, 32], strides = [1, 1]} : vector<16x36xbf16> to vector<16x32xbf16>
    %42 = vector.extract_strided_slice %34 {offsets = [0, 3], sizes = [16, 32], strides = [1, 1]} : vector<16x36xbf16> to vector<16x32xbf16>
    %43 = vector.broadcast %3 : vector<1x32xbf16> to vector<16x32xbf16>
    %44 = arith.mulf %42, %43 : vector<16x32xbf16>
    %45 = vector.extract_strided_slice %34 {offsets = [0, 4], sizes = [16, 32], strides = [1, 1]} : vector<16x36xbf16> to vector<16x32xbf16>
    %46 = vector.broadcast %4 : vector<1x32xbf16> to vector<16x32xbf16>
    %47 = arith.mulf %45, %46 : vector<16x32xbf16>
    %48 = tpu.concatenate %37, %40, %41, %44, %47 in 0 : vector<16x32xbf16>, vector<16x32xbf16>, vector<16x32xbf16>, vector<16x32xbf16>, vector<16x32xbf16> -> vector<80x32xbf16>
    %cst_15 = arith.constant dense<0.000000e+00> : vector<32x32xf32>
    %49 = tpu.matmul %31, %48, %cst_15 {dimension_numbers = #tpu.dot_dimension_numbers<[1], [0], [0], [1], [0, 0, 1, 1], [], []>} : vector<32x80xbf16>, vector<80x32xbf16>, vector<32x32xf32> -> vector<32x32xf32>
    %50 = vector.broadcast %32 : vector<32x1xf32> to vector<32x32xf32>
    %51 = arith.addf %49, %50 : vector<32x32xf32>
    %cst_16 = arith.constant 0.000000e+00 : f32
    %52 = vector.broadcast %cst_16 : f32 to vector<32x32xf32>
    %53 = arith.maximumf %51, %52 : vector<32x32xf32>
    %54 = arith.truncf %53 : vector<32x32xf32> to vector<32x32xbf16>
    %c0_17 = arith.constant 0 : index
    %c0_18 = arith.constant 0 : index
    %55 = vector.load %arg7[%c0_17, %c0_18] : memref<16x160xbf16, #tpu.memory_space<vmem>>, vector<16x160xbf16>
    %c0_19 = arith.constant 0 : index
    %c0_20 = arith.constant 0 : index
    %56 = vector.load %arg8[%c0_19, %c0_20] : memref<16x1xf32, #tpu.memory_space<vmem>>, vector<16x1xf32>
    %cst_21 = arith.constant 0.000000e+00 : bf16
    %57 = vector.broadcast %cst_21 : bf16 to vector<32x2xbf16>
    %58 = tpu.concatenate %57, %54, %57 in 1 : vector<32x2xbf16>, vector<32x32xbf16>, vector<32x2xbf16> -> vector<32x36xbf16>
    %59 = vector.extract_strided_slice %58 {offsets = [0, 0], sizes = [32, 32], strides = [1, 1]} : vector<32x36xbf16> to vector<32x32xbf16>
    %60 = vector.broadcast %1 : vector<1x32xbf16> to vector<32x32xbf16>
    %61 = arith.mulf %59, %60 : vector<32x32xbf16>
    %62 = vector.extract_strided_slice %58 {offsets = [0, 1], sizes = [32, 32], strides = [1, 1]} : vector<32x36xbf16> to vector<32x32xbf16>
    %63 = vector.broadcast %2 : vector<1x32xbf16> to vector<32x32xbf16>
    %64 = arith.mulf %62, %63 : vector<32x32xbf16>
    %65 = vector.extract_strided_slice %58 {offsets = [0, 2], sizes = [32, 32], strides = [1, 1]} : vector<32x36xbf16> to vector<32x32xbf16>
    %66 = vector.extract_strided_slice %58 {offsets = [0, 3], sizes = [32, 32], strides = [1, 1]} : vector<32x36xbf16> to vector<32x32xbf16>
    %67 = vector.broadcast %3 : vector<1x32xbf16> to vector<32x32xbf16>
    %68 = arith.mulf %66, %67 : vector<32x32xbf16>
    %69 = vector.extract_strided_slice %58 {offsets = [0, 4], sizes = [32, 32], strides = [1, 1]} : vector<32x36xbf16> to vector<32x32xbf16>
    %70 = vector.broadcast %4 : vector<1x32xbf16> to vector<32x32xbf16>
    %71 = arith.mulf %69, %70 : vector<32x32xbf16>
    %72 = tpu.concatenate %61, %64, %65, %68, %71 in 0 : vector<32x32xbf16>, vector<32x32xbf16>, vector<32x32xbf16>, vector<32x32xbf16>, vector<32x32xbf16> -> vector<160x32xbf16>
    %cst_22 = arith.constant dense<0.000000e+00> : vector<16x32xf32>
    %73 = tpu.matmul %55, %72, %cst_22 {dimension_numbers = #tpu.dot_dimension_numbers<[1], [0], [0], [1], [0, 0, 1, 1], [], []>} : vector<16x160xbf16>, vector<160x32xbf16>, vector<16x32xf32> -> vector<16x32xf32>
    %74 = vector.broadcast %56 : vector<16x1xf32> to vector<16x32xf32>
    %75 = arith.addf %73, %74 : vector<16x32xf32>
    %cst_23 = arith.constant 0.000000e+00 : f32
    %76 = vector.broadcast %cst_23 : f32 to vector<16x32xf32>
    %77 = arith.maximumf %75, %76 : vector<16x32xf32>
    %78 = arith.truncf %77 : vector<16x32xf32> to vector<16x32xbf16>
    %c0_24 = arith.constant 0 : index
    %c0_25 = arith.constant 0 : index
    %79 = vector.load %arg9[%c0_24, %c0_25] : memref<8x80xbf16, #tpu.memory_space<vmem>>, vector<8x80xbf16>
    %c0_26 = arith.constant 0 : index
    %c0_27 = arith.constant 0 : index
    %80 = vector.load %arg10[%c0_26, %c0_27] : memref<8x1xf32, #tpu.memory_space<vmem>>, vector<8x1xf32>
    %cst_28 = arith.constant 0.000000e+00 : bf16
    %81 = vector.broadcast %cst_28 : bf16 to vector<16x2xbf16>
    %82 = tpu.concatenate %81, %78, %81 in 1 : vector<16x2xbf16>, vector<16x32xbf16>, vector<16x2xbf16> -> vector<16x36xbf16>
    %83 = vector.extract_strided_slice %82 {offsets = [0, 0], sizes = [16, 32], strides = [1, 1]} : vector<16x36xbf16> to vector<16x32xbf16>
    %84 = vector.broadcast %1 : vector<1x32xbf16> to vector<16x32xbf16>
    %85 = arith.mulf %83, %84 : vector<16x32xbf16>
    %86 = vector.extract_strided_slice %82 {offsets = [0, 1], sizes = [16, 32], strides = [1, 1]} : vector<16x36xbf16> to vector<16x32xbf16>
    %87 = vector.broadcast %2 : vector<1x32xbf16> to vector<16x32xbf16>
    %88 = arith.mulf %86, %87 : vector<16x32xbf16>
    %89 = vector.extract_strided_slice %82 {offsets = [0, 2], sizes = [16, 32], strides = [1, 1]} : vector<16x36xbf16> to vector<16x32xbf16>
    %90 = vector.extract_strided_slice %82 {offsets = [0, 3], sizes = [16, 32], strides = [1, 1]} : vector<16x36xbf16> to vector<16x32xbf16>
    %91 = vector.broadcast %3 : vector<1x32xbf16> to vector<16x32xbf16>
    %92 = arith.mulf %90, %91 : vector<16x32xbf16>
    %93 = vector.extract_strided_slice %82 {offsets = [0, 4], sizes = [16, 32], strides = [1, 1]} : vector<16x36xbf16> to vector<16x32xbf16>
    %94 = vector.broadcast %4 : vector<1x32xbf16> to vector<16x32xbf16>
    %95 = arith.mulf %93, %94 : vector<16x32xbf16>
    %96 = tpu.concatenate %85, %88, %89, %92, %95 in 0 : vector<16x32xbf16>, vector<16x32xbf16>, vector<16x32xbf16>, vector<16x32xbf16>, vector<16x32xbf16> -> vector<80x32xbf16>
    %cst_29 = arith.constant dense<0.000000e+00> : vector<8x32xf32>
    %97 = tpu.matmul %79, %96, %cst_29 {dimension_numbers = #tpu.dot_dimension_numbers<[1], [0], [0], [1], [0, 0, 1, 1], [], []>} : vector<8x80xbf16>, vector<80x32xbf16>, vector<8x32xf32> -> vector<8x32xf32>
    %98 = vector.broadcast %80 : vector<8x1xf32> to vector<8x32xf32>
    %99 = arith.addf %97, %98 : vector<8x32xf32>
    %cst_30 = arith.constant 0.000000e+00 : f32
    %100 = vector.broadcast %cst_30 : f32 to vector<8x32xf32>
    %101 = arith.maximumf %99, %100 : vector<8x32xf32>
    %c0_31 = arith.constant 0 : index
    %c0_32 = arith.constant 0 : index
    %c0_33 = arith.constant 0 : index
    %102 = vector.load %arg11[%c0_31, %c0_32, %c0_33] : memref<1x8x32xf32, #tpu.memory_space<vmem>>, vector<1x8x32xf32>
    %103 = vector.shape_cast %102 : vector<1x8x32xf32> to vector<8x32xf32>
    %104 = vector.shape_cast %101 : vector<8x32xf32> to vector<1x8x32xf32>
    tpu.vector_store %arg11[%c0_31, %c0_32, %c0_33], %104 {strides = array<i32>} : memref<1x8x32xf32, #tpu.memory_space<vmem>>, vector<1x8x32xf32>,
    return
  }
  func.func @transform_0(%arg0: i32) -> (i32, i32, i32) {
    %c0_i32 = arith.constant 0 : i32
    %c0_i32_0 = arith.constant 0 : i32
    %c0_i32_1 = arith.constant 0 : i32
    return %arg0, %c0_i32, %c0_i32_0 : i32, i32, i32
  }
  func.func @transform_1(%arg0: i32) -> (i32, i32) {
    %c0_i32 = arith.constant 0 : i32
    %c0_i32_0 = arith.constant 0 : i32
    %c0_i32_1 = arith.constant 0 : i32
    return %c0_i32, %c0_i32_0 : i32, i32
  }
  func.func @transform_2(%arg0: i32) -> (i32, i32) {
    %c0_i32 = arith.constant 0 : i32
    %c0_i32_0 = arith.constant 0 : i32
    %c0_i32_1 = arith.constant 0 : i32
    return %c0_i32, %c0_i32_0 : i32, i32
  }
  func.func @transform_3(%arg0: i32) -> (i32, i32) {
    %c0_i32 = arith.constant 0 : i32
    %c0_i32_0 = arith.constant 0 : i32
    %c0_i32_1 = arith.constant 0 : i32
    return %c0_i32, %c0_i32_0 : i32, i32
  }
  func.func @transform_4(%arg0: i32) -> (i32, i32) {
    %c0_i32 = arith.constant 0 : i32
    %c0_i32_0 = arith.constant 0 : i32
    %c0_i32_1 = arith.constant 0 : i32
    return %c0_i32, %c0_i32_0 : i32, i32
  }
  func.func @transform_5(%arg0: i32) -> (i32, i32) {
    %c0_i32 = arith.constant 0 : i32
    %c0_i32_0 = arith.constant 0 : i32
    %c0_i32_1 = arith.constant 0 : i32
    return %c0_i32, %c0_i32_0 : i32, i32
  }
  func.func @transform_6(%arg0: i32) -> (i32, i32) {
    %c0_i32 = arith.constant 0 : i32
    %c0_i32_0 = arith.constant 0 : i32
    %c0_i32_1 = arith.constant 0 : i32
    return %c0_i32, %c0_i32_0 : i32, i32
  }
  func.func @transform_7(%arg0: i32) -> (i32, i32) {
    %c0_i32 = arith.constant 0 : i32
    %c0_i32_0 = arith.constant 0 : i32
    %c0_i32_1 = arith.constant 0 : i32
    return %c0_i32, %c0_i32_0 : i32, i32
  }
  func.func @transform_8(%arg0: i32) -> (i32, i32) {
    %c0_i32 = arith.constant 0 : i32
    %c0_i32_0 = arith.constant 0 : i32
    %c0_i32_1 = arith.constant 0 : i32
    return %c0_i32, %c0_i32_0 : i32, i32
  }
  func.func @transform_9(%arg0: i32) -> (i32, i32) {
    %c0_i32 = arith.constant 0 : i32
    %c0_i32_0 = arith.constant 0 : i32
    %c0_i32_1 = arith.constant 0 : i32
    return %c0_i32, %c0_i32_0 : i32, i32
  }
  func.func @transform_10(%arg0: i32) -> (i32, i32, i32) {
    %c0_i32 = arith.constant 0 : i32
    %c0_i32_0 = arith.constant 0 : i32
    %c0_i32_1 = arith.constant 0 : i32
    return %arg0, %c0_i32, %c0_i32_0 : i32, i32, i32
  }
}

</mosaic_0001>

<bundles_post_ra>
// kernel: tpu_custom_call.1
= control target key start
LH: loop header
LB: loop body
LE: loop exit
PB: predicated region body
PF: predicated region fallthrough
CT: control target
= control target key end

     0   :  { %v58_v1 = vlaneseq  ;;  %s638_s17 = smov 2   ;;  %s860_s0 = inlined_call_operand.vmem [shape: bf16[1,8,32], index: 0, kind: input, shape index: {}]   ;;  %s861_s1 = inlined_call_operand.vmem [shape: bf16[5,32], index: 1, kind: input, shape index: {}]   ;;  %s862_s2 = inlined_call_operand.vmem [shape: bf16[16,40], index: 2, kind: input, shape index: {}]   ;;  %s863_s3 = inlined_call_operand.vmem [shape: f32[16,1], index: 3, kind: input, shape index: {}]   ;;  %s864_s4 = inlined_call_operand.vmem [shape: bf16[32,80], index: 4, kind: input, shape index: {}]   ;;  %s865_s5 = inlined_call_operand.vmem [shape: f32[32,1], index: 5, kind: input, shape index: {}]   ;;  %s866_s6 = inlined_call_operand.vmem [shape: bf16[16,160], index: 6, kind: input, shape index: {}]   ;;  %s867_s7 = inlined_call_operand.vmem [shape: f32[16,1], index: 7, kind: input, shape index: {}]   ;;  %s868_s8 = inlined_call_operand.vmem [shape: bf16[8,80], index: 8, kind: input, shape index: {}]   ;;  %s869_s9 = inlined_call_operand.vmem [shape: f32[8,1], index: 9, kind: input, shape index: {}]   ;;  %s870_s10 = inlined_call_operand.hbm [shape: f32[1,8,32], index: 10, kind: output, shape index: {}]  }
   0x1   :  { %v607_v0 = vld [vmem:[%s860_s0] ss:$0 sps:$4 sm:$0xff]  }
   0x2   :  { %v37_v2 = vld [vmem:[%s861_s1] sm:$0x7]  ;;  %46 = vrot.lane.b32.xlu0 %v607_v0, %s638_s17  ;;  %v59_v3 = vshrl.u32 %v58_v1, 7 }
   0x3   :  { %v63_v4 = vshrl.u32 %v37_v2, 16  ;;  %v56_v5 = vpack.i.b16 %v37_v2, %v37_v2 }
   0x4   :  { %v77_v7 = vsub.s32 1, %v59_v3  ;;  %v60_v8 = vsub.s32 0, %v59_v3  ;;  %v86_v9 = vsub.s32 2, %v59_v3 }
   0x5   :  { %v64_v6 = vpack.i.b16 %v63_v4, %v63_v4 }
   0x6   :  { %v712_v12 = vrot.slane %v56_v5, %v60_v8 }
   0x7   :  { %v78_v10 = vrot.slane %v64_v6, %v77_v7  ;;  %v69_v11 = vrot.slane %v64_v6, %v60_v8 }
   0x8   :  { %15 = vsyncpa [#allocation3], 0  ;;  %s639_s0 = smov 3   ;;  %s640_s18 = smov 1   ;;  %v87_v13 = vrot.slane %v56_v5, %v86_v9  ;;  %vm48_vm0 = vcmask 15360   ;;  %v642_v14 = vmov 0.0  }
   0x9   :  { %80 = vrot.lane.b32.xlu1 %v78_v10, %s639_s0  ;;  %71 = vrot.lane.b32.xlu0 %v69_v11, %s640_s18  ;;  %s641_s1 = smov 4   ;;  %vm52_vm1 = vcmask 277504   ;;  %s643_s19 = smov 126   ;;  %vm644_vm2 = vmmov 0   ;;  %v646_v25 = vmov 0   ;;  %v42_v27 = vld [vmem:[%s863_s3 + $0x8] sm:$0xff] }
   0xa   :  { %555 = vmatprep.subr.bf16.mxu0 %v642_v14  ;;  %561 = vmatprep.mubr.msk.bf16.mxu0 %vm644_vm2, %v642_v14  ;;  %s645_s20 = smov 127   ;;  %s647_s21 = smov 124   ;;  %v41_v28 = vld [vmem:[%s863_s3] sm:$0xff]  ;;  %vm107_vm3 = vcmask 1043456   ;;  %vm131_vm4 = vcmask 326656   ;;  %vm247_vm5 = vcmask 654336  }
   0xb   :  { %606 = vset.pattern.permute.xlu1 %v646_v25  ;;  %605 = vset.pattern.permute.xlu0 %v646_v25  ;;  %s648_s24 = smov 125   ;;  %v608_v37 = vld [vmem:[%s862_s2] sm:$0xff]   ;;  %v187_v57 = vld [vmem:[%s865_s5 + $0x8] sm:$0xff]  ;;  %v189_v59 = vld [vmem:[%s865_s5 + $0x18] sm:$0xff]  ;;  %vm386_vm6 = vcmask 261120  }
   0xc   :  { %v609_v55 = vld [vmem:[%s864_s4] sm:$0xff]   ;;  %v188_v60 = vld [vmem:[%s865_s5 + $0x10] sm:$0xff]  ;;  %v610_v1 = vld [vmem:[%s864_s4 + $0x8] sm:$0xff]  }
   0xd   :  { %89 = vrot.lane.b32.xlu1 %v87_v13, %s641_s1  ;;  %575 = vmatprep.mubr.msk.bf16.mxu1 %vm247_vm5, %v609_v55  ;;  %v186_v58 = vld [vmem:[%s865_s5] sm:$0xff] }
  0x74   :  { %v47_v15 = vpop.permute.xlu0 %46 }
  0x75   :  { %v51_v16 = vsel %vm48_vm0, 0, %v47_v15 }
  0x76   :  { %v53_v17 = vsel %vm52_vm1, %v51_v16, 0 }
  0x77   :  { %98 = vrot.lane.b32.xlu1 %v53_v17, %s643_s19  ;;  %v62_v29 = vmul.bf16 %v712_v12, %v53_v17 }
  0x7b   :  { %v718_v18 = vpop.permute.xlu1 %80  ;;  %v720_v19 = vpop.permute.xlu0 %71 }
  0x7c   :  { %v74_v20 = vmul.bf16 %v720_v19, %v53_v17  ;;  %v83_v22 = vmul.bf16 %v718_v18, %v53_v17 }
  0x7e   :  { %v94_v21 = vrot.slane %v74_v20, 4  ;;  %v101_v26 = vrot.slane %v83_v22, 4 }
  0x7f   :  { %v726_v23 = vpop.permute.xlu1 %89 }
  0x80   :  { %95 = vrot.lane.b32.xlu0 %v94_v21, %s645_s20  ;;  %v92_v24 = vmul.bf16 %v726_v23, %v53_v17 }
  0x82   :  { %105 = vrot.lane.b32.xlu1 %v92_v24, %s647_s21 }
  0x84   :  { %102 = vrot.lane.b32.xlu0 %v101_v26, %s648_s24 }
  0x86   :  { %123 = vperm.xlu1 %606, %v42_v27  }
  0x88   :  { %118 = vperm.xlu0 %605, %v41_v28  }
  0xe9   :  { %v99_v32 = vpop.permute.xlu1 %98 }
  0xf2   :  { %v96_v30 = vpop.permute.xlu0 %95 }
  0xf3   :  { %v110_v31 = vsel %vm107_vm3, %v62_v29, %v96_v30 }
  0xf4   :  { %556 = vmatpush3.bf16.msra.mxu0 %v110_v31  ;;  %v106_v35 = vpop.permute.xlu1 %105 }
  0xf5   :  { %557 = vmatprep.subr.bf16.mxu0 %v642_v14  ;;  %v136_v36 = vsel %vm107_vm3, %v106_v35, 0 }
  0xf6   :  { %v103_v33 = vpop.permute.xlu0 %102 }
  0xf7   :  { %v114_v34 = vsel %vm107_vm3, %v99_v32, %v103_v33 }
  0xf8   :  { %558 = vmatpush3.bf16.msra.mxu0 %v114_v34 }
  0xf9   :  { %559 = vmatprep.subr.bf16.mxu0 %v642_v14 }
  0xfc   :  { %560 = vmatpush3.bf16.msra.mxu0 %v136_v36 }
  0xfd   :  { %390 = vmatprep.subr.bf16.mxu0 %v646_v25 }
  0xff   :  { %562 = vmatmul.mubr.msk.bf16.vlgmr.msra.gmra.mrb[0].mxu0 %vm131_vm4, %v608_v37 }
 0x105   :  { %v124_v40 = vpop.permute.xlu1 %123 }
 0x107   :  { %v119_v38 = vpop.permute.xlu0 %118 }
 0x1d2   :  { %v172_v39 = vpop.f32.mrb[0].mxu0 }
 0x1d3   :  { %v173_v41 = vadd.f32 %v172_v39, %v119_v38  ;;  %v563_v42 = vpop.f32.mrb[1].mxu0 }
 0x1d4   :  { %v175_v43 = vpop.f32.mrb[2].mxu0  ;;  %v611_v42 = vld [vmem:[%s866_s6 + $0x4] ss:$8 sps:$4 sm:$0xff]  }
 0x1d5   :  { %v176_v44 = vadd.f32 %v175_v43, %v124_v40  ;;  %v564_v45 = vpop.f32.mrb[3].mxu0  ;;  %v179_v46 = vmax.f32 %v173_v41, 0.0  ;;  %v312_v40 = vld [vmem:[%s867_s7 + $0x8] sm:$0xff]  ;;  %v311_v41 = vld [vmem:[%s867_s7] sm:$0xff]  ;;  %536 = vmatprep.mubr.msk.bf16.mxu0 %vm386_vm6, %v611_v42 }
 0x1d7   :  { %v180_v47 = vmax.f32 %v176_v44, 0.0 }
 0x1d9   :  { %v181_v48 = vpack.c.bf16 %v180_v47, %v179_v46 }
 0x1db   :  { %191 = vrot.lane.b32.xlu1 %v181_v48, %s638_s17 }
 0x24d   :  { %v192_v49 = vpop.permute.xlu1 %191 }
 0x24e   :  { %v194_v50 = vsel %vm48_vm0, 0, %v192_v49 }
 0x24f   :  { %v195_v51 = vsel %vm52_vm1, %v194_v50, 0 }
 0x250   :  { %206 = vrot.lane.b32.xlu1 %v195_v51, %s643_s19  ;;  %v198_v52 = vmul.bf16 %v195_v51, %v720_v19  ;;  %v197_v53 = vmul.bf16 %v195_v51, %v712_v12  ;;  %v200_v54 = vmul.bf16 %v195_v51, %v726_v23  ;;  %v199_v56 = vmul.bf16 %v195_v51, %v718_v18  ;;  %v613_v51 = vld [vmem:[%s866_s6] ss:$8 sps:$4 sm:$0xff]  }
 0x252   :  { %202 = vrot.lane.b32.xlu0 %v198_v52, %s645_s20  ;;  %565 = vmatprep.subr.bf16.mxu1 %v197_v53 }
 0x253   :  { %566 = vmatpush3.bf16.msra.mxu1 %v197_v53 }
 0x254   :  { %214 = vrot.lane.b32.xlu1 %v200_v54, %s647_s21 }
 0x256   :  { %210 = vrot.lane.b32.xlu0 %v199_v56, %s648_s24 }
 0x258   :  { %224 = vperm.xlu1 %606, %v187_v57  }
 0x25a   :  { %219 = vperm.xlu0 %605, %v186_v58  }
 0x25c   :  { %234 = vperm.xlu1 %606, %v189_v59  }
 0x25e   :  { %229 = vperm.xlu0 %605, %v188_v60  }
 0x2c2   :  { %v207_v62 = vpop.permute.xlu1 %206 }
 0x2c4   :  { %v203_v61 = vpop.permute.xlu0 %202 }
 0x2c5   :  { %567 = vmatprep.subr.bf16.mxu1 %v203_v61 }
 0x2c6   :  { %568 = vmatpush3.bf16.msra.mxu1 %v203_v61  ;;  %v215_v0 = vpop.permute.xlu1 %214 }
 0x2c7   :  { %569 = vmatprep.subr.bf16.mxu1 %v207_v62 }
 0x2c8   :  { %v211_v63 = vpop.permute.xlu0 %210 }
 0x2ca   :  { %570 = vmatpush3.bf16.msra.mxu1 %v207_v62 }
 0x2cb   :  { %571 = vmatprep.subr.bf16.mxu1 %v211_v63 }
 0x2ce   :  { %572 = vmatpush3.bf16.msra.mxu1 %v211_v63 }
 0x2cf   :  { %573 = vmatprep.subr.bf16.mxu1 %v215_v0 }
 0x2d2   :  { %574 = vmatpush3.bf16.msra.mxu1 %v215_v0 }
 0x2d3   :  { %579 = vmatprep.subr.bf16.mxu1 %v642_v14 }
 0x2d5   :  { %576 = vmatmul.mubr.msk.bf16.vlgmr.msra.gmra.mrb[0].mxu1 %vm247_vm5, %v610_v1 }
 0x2d6   :  { %589 = vmatprep.mubr.msk.bf16.mxu1 %vm644_vm2, %v642_v14 }
 0x2d7   :  { %v225_v3 = vpop.permute.xlu1 %224 }
 0x2d9   :  { %v220_v2 = vpop.permute.xlu0 %219 }
 0x2db   :  { %v235_v8 = vpop.permute.xlu1 %234 }
 0x2dd   :  { %v230_v4 = vpop.permute.xlu0 %229 }
 0x3a8   :  { %v577_v5 = vpop.f32.mrb[0].mxu1 }
 0x3a9   :  { %v297_v6 = vadd.f32 %v577_v5, %v230_v4  ;;  %v288_v7 = vpop.f32.mrb[1].mxu1  ;;  %v435_v5 = vld [vmem:[%s869_s9] sm:$0xff]  ;;  %s649_s9 = smov [#allocation2]  }
 0x3aa   :  { %v289_v9 = vadd.f32 %v288_v7, %v220_v2  ;;  %v578_v10 = vpop.f32.mrb[2].mxu1 }
 0x3ab   :  { %v300_v11 = vadd.f32 %v578_v10, %v235_v8  ;;  %v291_v13 = vpop.f32.mrb[3].mxu1  ;;  %v305_v16 = vmax.f32 %v297_v6, 0.0  ;;  %v434_v6 = vld [vmem:[%s868_s8] sm:$0xf] }
 0x3ac   :  { %v292_v15 = vadd.f32 %v291_v13, %v225_v3  ;;  %v303_v20 = vmax.f32 %v289_v9, 0.0 }
 0x3ad   :  { %v306_v17 = vmax.f32 %v300_v11, 0.0 }
 0x3ae   :  { %v304_v21 = vmax.f32 %v292_v15, 0.0 }
 0x3af   :  { %v308_v22 = vpack.c.bf16 %v306_v17, %v305_v16 }
 0x3b0   :  { %v307_v24 = vpack.c.bf16 %v304_v21, %v303_v20 }
 0x3b1   :  { %317 = vrot.lane.b32.xlu1 %v308_v22, %s638_s17 }
 0x3b2   :  { %315 = vrot.lane.b32.xlu0 %v307_v24, %s638_s17 }
 0x423   :  { %v318_v26 = vpop.permute.xlu1 %317 }
 0x424   :  { %v322_v27 = vsel %vm48_vm0, 0, %v318_v26  ;;  %v316_v28 = vpop.permute.xlu0 %315 }
 0x425   :  { %v325_v29 = vsel %vm52_vm1, %v322_v27, 0  ;;  %v320_v30 = vsel %vm48_vm0, 0, %v316_v28 }
 0x426   :  { %v323_v31 = vsel %vm52_vm1, %v320_v30, 0  ;;  %v330_v32 = vmul.bf16 %v325_v29, %v720_v19  ;;  %v328_v35 = vmul.bf16 %v325_v29, %v712_v12  ;;  %v332_v36 = vmul.bf16 %v325_v29, %v718_v18 }
 0x427   :  { %v329_v33 = vmul.bf16 %v323_v31, %v720_v19  ;;  %v327_v34 = vmul.bf16 %v323_v31, %v712_v12  ;;  %v331_v37 = vmul.bf16 %v323_v31, %v718_v18  ;;  %v334_v38 = vmul.bf16 %v325_v29, %v726_v23 }
 0x428   :  { %339 = vrot.lane.b32.xlu1 %v330_v32, %s645_s20  ;;  %v333_v39 = vmul.bf16 %v323_v31, %v726_v23 }
 0x429   :  { %337 = vrot.lane.b32.xlu0 %v329_v33, %s645_s20  ;;  %391 = vmatpush1.bf16.msra.mxu0 %v327_v34 }
 0x42a   :  { %392 = vmatprep.subr.bf16.mxu0 %v646_v25 }
 0x42c   :  { %347 = vrot.lane.b32.xlu1 %v325_v29, %s643_s19 }
 0x42d   :  { %345 = vrot.lane.b32.xlu0 %v323_v31, %s643_s19  ;;  %393 = vmatpush1.bf16.msra.mxu0 %v328_v35 }
 0x42e   :  { %394 = vmatprep.subr.bf16.mxu0 %v646_v25 }
 0x430   :  { %355 = vrot.lane.b32.xlu1 %v332_v36, %s648_s24 }
 0x431   :  { %353 = vrot.lane.b32.xlu0 %v331_v37, %s648_s24 }
 0x434   :  { %363 = vrot.lane.b32.xlu1 %v334_v38, %s647_s21 }
 0x435   :  { %361 = vrot.lane.b32.xlu0 %v333_v39, %s647_s21 }
 0x438   :  { %374 = vperm.xlu1 %606, %v312_v40  }
 0x439   :  { %369 = vperm.xlu0 %605, %v311_v41  }
 0x49a   :  { %v340_v44 = vpop.permute.xlu1 %339 }
 0x49b   :  { %v338_v43 = vpop.permute.xlu0 %337 }
 0x49c   :  { %395 = vmatpush1.bf16.msra.mxu0 %v338_v43 }
 0x49d   :  { %396 = vmatprep.subr.bf16.mxu0 %v646_v25 }
 0x49e   :  { %v348_v46 = vpop.permute.xlu1 %347 }
 0x49f   :  { %v346_v45 = vpop.permute.xlu0 %345 }
 0x4a0   :  { %397 = vmatpush1.bf16.msra.mxu0 %v340_v44 }
 0x4a1   :  { %398 = vmatprep.subr.bf16.mxu0 %v646_v25 }
 0x4a2   :  { %v356_v48 = vpop.permute.xlu1 %355 }
 0x4a3   :  { %v354_v47 = vpop.permute.xlu0 %353 }
 0x4a4   :  { %399 = vmatpush1.bf16.msra.mxu0 %v346_v45 }
 0x4a5   :  { %400 = vmatprep.subr.bf16.mxu0 %v646_v25 }
 0x4a6   :  { %v364_v50 = vpop.permute.xlu1 %363 }
 0x4a7   :  { %v362_v49 = vpop.permute.xlu0 %361 }
 0x4a8   :  { %401 = vmatpush1.bf16.msra.mxu0 %v348_v46 }
 0x4a9   :  { %402 = vmatprep.subr.bf16.mxu0 %v646_v25 }
 0x4ac   :  { %403 = vmatpush1.bf16.msra.mxu0 %v354_v47 }
 0x4ad   :  { %404 = vmatprep.subr.bf16.mxu0 %v646_v25 }
 0x4b0   :  { %405 = vmatpush1.bf16.msra.mxu0 %v356_v48 }
 0x4b1   :  { %406 = vmatprep.subr.bf16.mxu0 %v646_v25 }
 0x4b4   :  { %407 = vmatpush1.bf16.msra.mxu0 %v362_v49 }
 0x4b5   :  { %408 = vmatprep.subr.bf16.mxu0 %v646_v25 }
 0x4b7   :  { %v375_v56 = vpop.permute.xlu1 %374 }
 0x4b8   :  { %409 = vmatpush1.bf16.msra.mxu0 %v364_v50  ;;  %v370_v52 = vpop.permute.xlu0 %369 }
 0x4bb   :  { %423 = vmatmul.mubr.bf16.vlgmr.msra.gmra.mrb[4].mxu0 %v613_v51 }
 0x58e   :  { %v424_v53 = vpop.f32.mrb[4].mxu0 }
 0x58f   :  { %v425_v54 = vadd.f32 %v424_v53, %v370_v52  ;;  %v426_v55 = vpop.f32.mrb[5].mxu0 }
 0x590   :  { %v427_v57 = vpop.f32.mrb[6].mxu0 }
 0x591   :  { %v428_v58 = vadd.f32 %v427_v57, %v375_v56  ;;  %v429_v59 = vpop.f32.mrb[7].mxu0  ;;  %v431_v60 = vmax.f32 %v425_v54, 0.0 }
 0x593   :  { %v432_v61 = vmax.f32 %v428_v58, 0.0 }
 0x595   :  { %v433_v62 = vpack.c.bf16 %v432_v61, %v431_v60 }
 0x597   :  { %437 = vrot.lane.b32.xlu0 %v433_v62, %s638_s17 }
 0x609   :  { %v438_v25 = vpop.permute.xlu0 %437 }
 0x60a   :  { %v440_v63 = vsel %vm48_vm0, 0, %v438_v25 }
 0x60b   :  { %v441_v0 = vsel %vm52_vm1, %v440_v63, 0 }
 0x60c   :  { %452 = vrot.lane.b32.xlu0 %v441_v0, %s643_s19  ;;  %v444_v1 = vmul.bf16 %v441_v0, %v720_v19  ;;  %v443_v2 = vmul.bf16 %v441_v0, %v712_v12  ;;  %v446_v3 = vmul.bf16 %v441_v0, %v726_v23  ;;  %v445_v4 = vmul.bf16 %v441_v0, %v718_v18 }
 0x60e   :  { %448 = vrot.lane.b32.xlu1 %v444_v1, %s645_s20  ;;  %580 = vmatpush3.bf16.msra.mxu1 %v443_v2 }
 0x60f   :  { %581 = vmatprep.subr.bf16.mxu1 %v642_v14 }
 0x610   :  { %460 = vrot.lane.b32.xlu0 %v446_v3, %s647_s21  ;;  %s519_s21 = sshll.u32 %s649_s9, 4  ;;  %s520_s21 = int_to_ptr.vmem [resolvable:$true] %s519_s21 }
 0x611   :  { %p619_p1 = scmp.lt.s32.totalorder %s520_s21, %s520_s21 }
 0x612   :  { %456 = vrot.lane.b32.xlu1 %v445_v4, %s648_s24  ;;  %s614_s24 = scalar_lea.vmem %s520_s21, 128 }
 0x613   :  { %p615_p0 = scmp.ne.s32.totalorder %s520_s21, %s614_s24  ;;  %p620_p2 = scmp.lt.s32.totalorder %s614_s24, %s614_s24 }
 0x615   :  { %p621_p3 = por %p620_p2, %p619_p1 }
 0x616   :  { %465 = vperm.xlu1 %606, %v435_v5  }
 0x617   :  { %p622_p4 = pnand %p621_p3, %p615_p0 }
 0x67e   :  { %v453_v12 = vpop.permute.xlu0 %452 }
 0x680   :  { %v449_v19 = vpop.permute.xlu1 %448 }
 0x681   :  { %582 = vmatpush3.bf16.msra.mxu1 %v449_v19 }
 0x682   :  { %583 = vmatprep.subr.bf16.mxu1 %v642_v14  ;;  %v461_v18 = vpop.permute.xlu0 %460 }
 0x684   :  { %v457_v23 = vpop.permute.xlu1 %456 }
 0x685   :  { %584 = vmatpush3.bf16.msra.mxu1 %v453_v12 }
 0x686   :  { %585 = vmatprep.subr.bf16.mxu1 %v642_v14 }
 0x689   :  { %586 = vmatpush3.bf16.msra.mxu1 %v457_v23 }
 0x68a   :  { %587 = vmatprep.subr.bf16.mxu1 %v642_v14 }
 0x68d   :  { %588 = vmatpush3.bf16.msra.mxu1 %v461_v18 }
 0x690   :  { %590 = vmatmul.mubr.msk.bf16.vlgmr.msra.gmra.mrb[4].mxu1 %vm247_vm5, %v434_v6 }
 0x695   :  { %v466_v7 = vpop.permute.xlu1 %465 }
 0x763   :  { %v505_v8 = vpop.f32.mrb[4].mxu1 }
 0x764   :  { %v506_v9 = vadd.f32 %v505_v8, %v466_v7  ;;  %v591_v10 = vpop.f32.mrb[5].mxu1 }
 0x765   :  { %v508_v11 = vpop.f32.mrb[6].mxu1 }
 0x766   :  { %v511_v13 = vmax.f32 %v506_v9, 0.0  ;;  %v592_v15 = vpop.f32.mrb[7].mxu1 }
 0x768   :  { %512 = vst.msk [vmem:[#allocation2] sm:$0xff] %vm386_vm6, %v511_v13 }
 0x769   :  { %625 = shalt.err (!%p622_p4)
}
 0x76a   :  { %s626_s3 = scalar_lea.hbm %s870_s10, 128 }
 0x76b   :  { %p627_p5 = scmp.ne.s32.totalorder %s870_s10, %s626_s3  ;;  %p630_p6 = scmp.lt.u32.totalorder %s626_s3, %s870_s10 }
 0x76d   :  { %p632_p7 = pnand %p630_p6, %p627_p5 }
 0x76f   :  { %635 = shalt.err (!%p632_p7)
}
 0x770   :  { %522 = dma.vmem_to_hbm [thread:$0]  %s520_s21, 128, %s870_s10, [#allocation3]  }
 0x771   :  { %636 = dma.done.wait [#allocation3], 128  }
 0x772   :  { %637 = vsyncadd [#allocation3], 4294967168 }
 0x773   :  { %526 = vsyncpa [#allocation3], 1 }

</bundles_post_ra>
